<compile_context>
chip_gen: v5e
topology: v5e:2x2
jax: 0.10.0
libtpu: 0.0.40
codegen_flags: <defaults>
</compile_context>

<pallas_src>
import math
import functools

import jax
import jax.numpy as jnp
from jax import lax
from jax.experimental import pallas as pl
from jax.experimental.pallas import tpu as pltpu


_EPS = 1e-12  # torch F.normalize default eps


def _round_up(v, m):
    return -(-v // m) * m


def _sublane(dtype):
    return {4: 8, 2: 16, 1: 32}[jnp.dtype(dtype).itemsize]


# ---------------------------------------------------------------------------
# Prologue kernel: inverse L2 row norms.  1/max(||row||, eps) via rsqrt (EUP).
# ---------------------------------------------------------------------------
def _row_inv_norm_kernel(m_ref, o_ref, *, eps):
    m = m_ref[...].astype(jnp.float32)
    sumsq = jnp.sum(m * m, axis=-1, keepdims=True)
    # 1 / max(||row||_2, eps) == rsqrt(max(sum(row^2), eps^2))
    o_ref[...] = lax.rsqrt(jnp.maximum(sumsq, eps * eps))


def _row_inv_norms(mat, block_rows, eps=_EPS):
    rows, feat = mat.shape
    assert rows % block_rows == 0
    return pl.pallas_call(
        functools.partial(_row_inv_norm_kernel, eps=eps),
        out_shape=jax.ShapeDtypeStruct((rows, 1), jnp.float32),
        grid=(rows // block_rows,),
        in_specs=[pl.BlockSpec((block_rows, feat), lambda i: (i, 0))],
        out_specs=pl.BlockSpec((block_rows, 1), lambda i: (i, 0)),
        compiler_params=pltpu.CompilerParams(dimension_semantics=("parallel",)),
    )(mat)


# ---------------------------------------------------------------------------
# Main kernels: one (TM, TN) output tile per grid step.
# Grid is (class_tiles, batch_tiles): batch innermost -> weight tile resident.
# ---------------------------------------------------------------------------
def _arcmargin_train_kernel(x_ref, w_ref, xin_ref, win_ref, label_ref, out_ref,
                            *, s, cos_m, sin_m, th, mm, easy_margin, tn):
    jc = pl.program_id(0)  # class-tile index

    # Raw (un-normalized) matmul on the MXU (bf16 in, f32 accumulate).
    raw = lax.dot_general(
        x_ref[...], w_ref[...],
        dimension_numbers=(((1,), (1,)), ((), ())),
        preferred_element_type=jnp.float32,
    )                                                     # (TM, TN)

    # Fold the L2 norms in as a post-matmul row/column scale (f32).
    cosine = raw * xin_ref[...] * win_ref[...]            # (TM,1)*(1,TN) bcast

    # One-hot mask with GLOBAL class index (offset by this tile's column base).
    class_ids = jc * tn + lax.broadcasted_iota(jnp.int32, cosine.shape, 1)
    is_target = class_ids == label_ref[...]               # (TM, TN) bool

    # O(B) margin math: gather cosine at the label column (0.0 if the label
    # is not in this C tile -> correction masked out by the select anyway).
    cos_lbl = jnp.sum(jnp.where(is_target, cosine, 0.0), axis=1, keepdims=True)
    sin_lbl = jnp.sqrt(jnp.maximum(1.0 - cos_lbl * cos_lbl, 0.0))
    phi_lbl = cos_lbl * cos_m - sin_lbl * sin_m
    if easy_margin:
        phi_lbl = jnp.where(cos_lbl > 0.0, phi_lbl, cos_lbl)
    else:
        phi_lbl = jnp.where(cos_lbl > th, phi_lbl, cos_lbl - mm)

    out = jnp.where(is_target, phi_lbl, cosine) * s
    out_ref[...] = out.astype(out_ref.dtype)


def _arcmargin_eval_kernel(x_ref, w_ref, xin_ref, win_ref, out_ref, *, s):
    raw = lax.dot_general(
        x_ref[...], w_ref[...],
        dimension_numbers=(((1,), (1,)), ((), ())),
        preferred_element_type=jnp.float32,
    )
    out_ref[...] = (raw * xin_ref[...] * (win_ref[...] * s)).astype(out_ref.dtype)


# ---------------------------------------------------------------------------
# Module wrapper
# ---------------------------------------------------------------------------
class ArcMarginProductPallas:
    def __init__(self, in_features, out_features, s=30.0, m=0.5,
                 easy_margin=False, key=None,
                 block_b=128, block_c=512, compute_dtype=jnp.bfloat16):
        sub = _sublane(compute_dtype)
        assert block_b % sub == 0 and block_c % 128 == 0
        self.in_features = in_features
        self.out_features = out_features
        self.s = float(s)
        self.m = float(m)
        self.easy_margin = easy_margin
        self.cos_m = math.cos(m)
        self.sin_m = math.sin(m)
        self.th = math.cos(math.pi - m)
        self.mm = math.sin(math.pi - m) * m
        self.block_b = block_b
        self.block_c = block_c
        self.compute_dtype = compute_dtype

        # Deterministic xavier_uniform init (same bound/shape as nn.init).
        if key is None:
            key = jax.random.PRNGKey(0)
        bound = math.sqrt(6.0 / (in_features + out_features))
        self.weight = jax.random.uniform(
            key, (out_features, in_features), dtype=jnp.float32,
            minval=-bound, maxval=bound)

        # ---- weight-side tiling + precomputation (done ONCE, not per call) --
        self.tn = min(block_c, _round_up(out_features, 128))
        self.c_pad = _round_up(out_features, self.tn)
        w_pad = self.weight
        if self.c_pad != out_features:
            w_pad = jnp.pad(w_pad, ((0, self.c_pad - out_features), (0, 0)))
        self._w_inv = _row_inv_norms(w_pad, self.tn).reshape(1, self.c_pad)
        self._w_cast = w_pad.astype(compute_dtype)        # bf16 weight in HBM

    def __call__(self, x, label=None, training=True):
        B, D = x.shape
        C = self.out_features
        assert D == self.in_features

        # ---- batch-side tile sizes & padding (lane/sublane friendly) ----
        sub = _sublane(self.compute_dtype)
        tm = min(self.block_b, _round_up(B, sub))
        b_pad = _round_up(B, tm)
        tn, c_pad = self.tn, self.c_pad

        x_f32 = x.astype(jnp.float32)
        if b_pad != B:
            x_f32 = jnp.pad(x_f32, ((0, b_pad - B), (0, 0)))

        # ---- prologue: inverse row norms (computed once, not per tile) ----
        x_inv = _row_inv_norms(x_f32, tm)                  # (b_pad, 1) f32
        x_cast = x_f32.astype(self.compute_dtype)          # bf16 MXU operand

        n_ct = c_pad // tn
        n_bt = b_pad // tm
        grid = (n_ct, n_bt)   # class tiles outer, batch inner -> W resident
        out_shape = jax.ShapeDtypeStruct((b_pad, c_pad), jnp.float32)
        cparams = pltpu.CompilerParams(
            dimension_semantics=("parallel", "parallel"))
        cost = pl.CostEstimate(
            flops=2 * b_pad * c_pad * D,
            transcendentals=b_pad * n_ct,
            bytes_accessed=(x_cast.dtype.itemsize * b_pad * D * n_ct
                            + self._w_cast.dtype.itemsize * c_pad * D
                            + 4 * b_pad * c_pad),
        )

        x_spec = pl.BlockSpec((tm, D), lambda j, i: (i, 0))
        w_spec = pl.BlockSpec((tn, D), lambda j, i: (j, 0))
        xin_spec = pl.BlockSpec((tm, 1), lambda j, i: (i, 0))
        win_spec = pl.BlockSpec((1, tn), lambda j, i: (0, j))
        out_spec = pl.BlockSpec((tm, tn), lambda j, i: (i, j))

        if training:
            assert label is not None
            lbl = label.reshape(-1).astype(jnp.int32)
            if b_pad != B:
                lbl = jnp.pad(lbl, (0, b_pad - B))
            lbl2d = lbl.reshape(b_pad, 1)

            kernel = functools.partial(
                _arcmargin_train_kernel,
                s=self.s, cos_m=self.cos_m, sin_m=self.sin_m,
                th=self.th, mm=self.mm, easy_margin=self.easy_margin, tn=tn)
            out_p = pl.pallas_call(
                kernel,
                out_shape=out_shape,
                grid=grid,
                in_specs=[x_spec, w_spec, xin_spec, win_spec,
                          pl.BlockSpec((tm, 1), lambda j, i: (i, 0))],  # label
                out_specs=out_spec,
                compiler_params=cparams,
                cost_estimate=cost,
            )(x_cast, self._w_cast, x_inv, self._w_inv, lbl2d)
        else:
            assert label is None
            kernel = functools.partial(_arcmargin_eval_kernel, s=self.s)
            out_p = pl.pallas_call(
                kernel,
                out_shape=out_shape,
                grid=grid,
                in_specs=[x_spec, w_spec, xin_spec, win_spec],
                out_specs=out_spec,
                compiler_params=cparams,
                cost_estimate=cost,
            )(x_cast, self._w_cast, x_inv, self._w_inv)

        return out_p[:B, :C]


# ---------------------------------------------------------------------------
# Plain-JAX reference reproducing the PyTorch forward (matmul dtype matched
# to the kernel's MXU dtype so branch decisions line up).
# ---------------------------------------------------------------------------
def _reference(module, x, label=None, training=True, eps=_EPS):
    inv_x = lax.rsqrt(jnp.maximum(jnp.sum(x * x, -1, keepdims=True), eps * eps))
    w = module.weight
    inv_w = lax.rsqrt(jnp.maximum(jnp.sum(w * w, -1, keepdims=True), eps * eps))
    xm = x.astype(module.compute_dtype).astype(jnp.float32)
    wm = w.astype(module.compute_dtype).astype(jnp.float32)
    cosine = jnp.dot(xm, wm.T, precision=lax.Precision.HIGHEST)
    cosine = cosine * inv_x * inv_w.reshape(1, -1)
    if not training:
        return module.s * cosine
    sine = jnp.sqrt(jnp.clip(1.0 - cosine ** 2, 0.0, 1.0))
    phi = cosine * module.cos_m - sine * module.sin_m
    if module.easy_margin:
        phi = jnp.where(cosine > 0, phi, cosine)
    else:
        phi = jnp.where(cosine > module.th, phi, cosine - module.mm)
    one_hot = jax.nn.one_hot(label, module.out_features, dtype=jnp.float32)
    return (one_hot * phi + (1.0 - one_hot) * cosine) * module.s


if __name__ == "__main__":
    key = jax.random.PRNGKey(0)
    k_x, k_w, k_lbl = jax.random.split(key, 3)

    B, in_features, out_features = 8, 32, 16
    x = jax.random.normal(k_x, (B, in_features), dtype=jnp.float32)
    label = jax.random.randint(k_lbl, (B,), 0, out_features, dtype=jnp.int32)

    module = ArcMarginProductPallas(in_features, out_features, s=30.0, m=0.5,
                                    easy_margin=False, key=k_w)

    # Training-mode forward (with labels / margin).
    out_train = jax.block_until_ready(module(x, label, training=True))
    # Eval-mode forward (plain scaled cosine).
    out_eval = jax.block_until_ready(module(x, None, training=False))

    ref_train = _reference(module, x, label, training=True)
    ref_eval = _reference(module, x, None, training=False)

    assert out_train.shape == (B, out_features)
    assert out_eval.shape == (B, out_features)
    assert jnp.allclose(out_train, ref_train, atol=2e-2, rtol=1e-3), (
        float(jnp.max(jnp.abs(out_train - ref_train))))
    assert jnp.allclose(out_eval, ref_eval, atol=2e-2, rtol=1e-3), (
        float(jnp.max(jnp.abs(out_eval - ref_eval))))

    print("KERNEL_OK")
</pallas_src>

<mosaic_0001>
module attributes {stable_mosaic.version = 11 : i64} {
  func.func @_row_inv_norm_kernel(%arg0: i32, %arg1: memref<128x32xf32, #tpu.memory_space<vmem>>, %arg2: memref<128x1xf32, #tpu.memory_space<vmem>>) attributes {dimension_semantics = [#tpu.dimension_semantics<parallel>], iteration_bounds = array<i64: 1>, scalar_prefetch = 0 : i64, scratch_operands = 0 : i64, tpu.core_type = #tpu.core_type<tc>, window_params = [{transform_indices = @transform_0, window_bounds = array<i64: 128, 32>}, {transform_indices = @transform_1, window_bounds = array<i64: 128, 1>}]} {
    %c0 = arith.constant 0 : index
    %c0_0 = arith.constant 0 : index
    %0 = vector.load %arg1[%c0, %c0_0] : memref<128x32xf32, #tpu.memory_space<vmem>>, vector<128x32xf32>
    %1 = arith.mulf %0, %0 : vector<128x32xf32>
    %cst = arith.constant dense<0.000000e+00> : vector<128xf32>
    %2 = vector.multi_reduction <add>, %1, %cst [1] : vector<128x32xf32> to vector<128xf32>
    %3 = vector.shape_cast %2 : vector<128xf32> to vector<128x1xf32>
    %cst_1 = arith.constant 1.000000e-24 : f32
    %4 = vector.broadcast %cst_1 : f32 to vector<128x1xf32>
    %5 = arith.maximumf %3, %4 : vector<128x1xf32>
    %6 = math.rsqrt %5 : vector<128x1xf32>
    %c0_2 = arith.constant 0 : index
    %c0_3 = arith.constant 0 : index
    %7 = vector.load %arg2[%c0_2, %c0_3] : memref<128x1xf32, #tpu.memory_space<vmem>>, vector<128x1xf32>
    tpu.vector_store %arg2[%c0_2, %c0_3], %6 {strides = array<i32>} : memref<128x1xf32, #tpu.memory_space<vmem>>, vector<128x1xf32>,
    return
  }
  func.func @transform_0(%arg0: i32) -> (i32, i32) {
    %c0_i32 = arith.constant 0 : i32
    %c0_i32_0 = arith.constant 0 : i32
    return %arg0, %c0_i32 : i32, i32
  }
  func.func @transform_1(%arg0: i32) -> (i32, i32) {
    %c0_i32 = arith.constant 0 : i32
    %c0_i32_0 = arith.constant 0 : i32
    return %arg0, %c0_i32 : i32, i32
  }
}

</mosaic_0001>

<bundles_post_ra>
// kernel: tpu_custom_call.1
= control target key start
LH: loop header
LB: loop body
LE: loop exit
PB: predicated region body
PF: predicated region fallthrough
CT: control target
= control target key end

     0   :  { %vm40_vm0 = vcmask 261120   ;;  %vm265_vm1 = vcmask 7168   ;;  %s552_s0 = inlined_call_operand.vmem [shape: f32[128,32], index: 0, kind: input, shape index: {}]   ;;  %s553_s1 = inlined_call_operand.vmem [shape: f32[128,1], index: 1, kind: output, shape index: {}]  }
   0x1   :  { %v12_v0 = vld [vmem:[%s552_s0 + $0x20] sm:$0xff]  ;;  %v10_v1 = vld [vmem:[%s552_s0 + $0x10] sm:$0xff]  ;;  %v13_v6 = vld [vmem:[%s552_s0 + $0x28] sm:$0xff] }
   0x2   :  { %v8_v2 = vld [vmem:[%s552_s0] sm:$0xff]  ;;  %v28_v3 = vmul.f32 %v12_v0, %v12_v0  ;;  %v26_v4 = vmul.f32 %v10_v1, %v10_v1  ;;  %v11_v7 = vld [vmem:[%s552_s0 + $0x18] sm:$0xff]  ;;  %v9_v11 = vld [vmem:[%s552_s0 + $0x8] sm:$0xff]  ;;  %v29_v12 = vmul.f32 %v13_v6, %v13_v6 }
   0x3   :  { %v24_v5 = vmul.f32 %v8_v2, %v8_v2  ;;  %v27_v13 = vmul.f32 %v11_v7, %v11_v7  ;;  %v25_v14 = vmul.f32 %v9_v11, %v9_v11  ;;  %v16_v18 = vld [vmem:[%s552_s0 + $0x40] sm:$0xff]  ;;  %v15_v19 = vld [vmem:[%s552_s0 + $0x38] sm:$0xff]  ;;  %v14_v20 = vld [vmem:[%s552_s0 + $0x30] sm:$0xff] }
   0x4   :  { %v53_v8 = vsel %vm40_vm0, %v28_v3, 0.0  ;;  %v47_v9 = vsel %vm40_vm0, %v26_v4, 0.0  ;;  %v56_v15 = vsel %vm40_vm0, %v29_v12, 0.0  ;;  %v32_v21 = vmul.f32 %v16_v18, %v16_v18  ;;  %v19_v27 = vld [vmem:[%s552_s0 + $0x58] sm:$0xff]  ;;  %v18_v28 = vld [vmem:[%s552_s0 + $0x50] sm:$0xff]  ;;  %v17_v29 = vld [vmem:[%s552_s0 + $0x48] sm:$0xff] }
   0x5   :  { %v41_v10 = vsel %vm40_vm0, %v24_v5, 0.0  ;;  %54 = vadd.xlane.f32.xlu2 %v53_v8  ;;  %48 = vadd.xlane.f32.xlu1 %v47_v9  ;;  %v50_v16 = vsel %vm40_vm0, %v27_v13, 0.0  ;;  %v44_v17 = vsel %vm40_vm0, %v25_v14, 0.0  ;;  %v31_v22 = vmul.f32 %v15_v19, %v15_v19  ;;  %v22_v36 = vld [vmem:[%s552_s0 + $0x70] sm:$0xff]  ;;  %v21_v37 = vld [vmem:[%s552_s0 + $0x68] sm:$0xff]  ;;  %v20_v38 = vld [vmem:[%s552_s0 + $0x60] sm:$0xff] }
   0x6   :  { %42 = vadd.xlane.f32.xlu0 %v41_v10  ;;  %v30_v23 = vmul.f32 %v14_v20, %v14_v20  ;;  %v65_v24 = vsel %vm40_vm0, %v32_v21, 0.0  ;;  %v35_v30 = vmul.f32 %v19_v27, %v19_v27  ;;  %v34_v31 = vmul.f32 %v18_v28, %v18_v28  ;;  %v23_v45 = vld [vmem:[%s552_s0 + $0x78] sm:$0xff] }
   0x7   :  { %v62_v25 = vsel %vm40_vm0, %v31_v22, 0.0  ;;  %v33_v32 = vmul.f32 %v17_v29, %v17_v29  ;;  %v38_v39 = vmul.f32 %v22_v36, %v22_v36  ;;  %v37_v40 = vmul.f32 %v21_v37, %v21_v37 }
   0x8   :  { %v59_v26 = vsel %vm40_vm0, %v30_v23, 0.0  ;;  %v74_v33 = vsel %vm40_vm0, %v35_v30, 0.0  ;;  %v71_v34 = vsel %vm40_vm0, %v34_v31, 0.0  ;;  %v36_v41 = vmul.f32 %v20_v38, %v20_v38 }
   0x9   :  { %v68_v35 = vsel %vm40_vm0, %v33_v32, 0.0  ;;  %v83_v42 = vsel %vm40_vm0, %v38_v39, 0.0  ;;  %v80_v43 = vsel %vm40_vm0, %v37_v40, 0.0  ;;  %v39_v46 = vmul.f32 %v23_v45, %v23_v45 }
   0xa   :  { %v77_v44 = vsel %vm40_vm0, %v36_v41, 0.0 }
   0xb   :  { %v86_v47 = vsel %vm40_vm0, %v39_v46, 0.0 }
   0xd   :  { %57 = vadd.xlane.f32.xlu2 %v56_v15  ;;  %51 = vadd.xlane.f32.xlu1 %v50_v16 }
   0xe   :  { %45 = vadd.xlane.f32.xlu0 %v44_v17 }
  0x15   :  { %66 = vadd.xlane.f32.xlu2 %v65_v24  ;;  %63 = vadd.xlane.f32.xlu1 %v62_v25 }
  0x16   :  { %60 = vadd.xlane.f32.xlu0 %v59_v26 }
  0x1d   :  { %75 = vadd.xlane.f32.xlu2 %v74_v33  ;;  %72 = vadd.xlane.f32.xlu1 %v71_v34 }
  0x1e   :  { %69 = vadd.xlane.f32.xlu0 %v68_v35 }
  0x25   :  { %84 = vadd.xlane.f32.xlu2 %v83_v42  ;;  %81 = vadd.xlane.f32.xlu1 %v80_v43 }
  0x26   :  { %78 = vadd.xlane.f32.xlu0 %v77_v44 }
  0x2e   :  { %87 = vadd.xlane.f32.xlu0 %v86_v47 }
  0x78   :  { %v55_v48 = vpop.xlane.xlu2 %54  ;;  %v49_v49 = vpop.xlane.xlu1 %48 }
  0x79   :  { %v93_v50 = vmax.f32 %v55_v48, 1e-24  ;;  %v91_v51 = vmax.f32 %v49_v49, 1e-24  ;;  %v43_v52 = vpop.xlane.xlu0 %42 }
  0x7a   :  { %v89_v53 = vmax.f32 %v43_v52, 1e-24 }
  0x7b   :  { %286 = vrsqrt.f32 %v93_v50  ;;  %vm151_vm2 = vweird.f32 %v93_v50  ;;  %vm131_vm4 = vweird.f32 %v91_v51 }
  0x7c   :  { %288 = vrsqrt.f32 %v91_v51  ;;  %vm111_vm8 = vweird.f32 %v89_v53 }
  0x7d   :  { %290 = vrsqrt.f32 %v89_v53 }
  0x80   :  { %v58_v54 = vpop.xlane.xlu2 %57  ;;  %v52_v55 = vpop.xlane.xlu1 %51 }
  0x81   :  { %v287_v56 = vpop.eup %286  ;;  %v392_v57 = vmax.f32 %v58_v54, 1e-24  ;;  %v394_v58 = vmax.f32 %v52_v55, 1e-24  ;;  %v46_v59 = vpop.xlane.xlu0 %45 }
  0x82   :  { %v289_v60 = vpop.eup %288  ;;  %v146_v61 = vmul.f32 %v287_v56, %v93_v50  ;;  %v396_v62 = vmax.f32 %v46_v59, 1e-24  ;;  %vm152_vm3 = vweird.f32 %v287_v56 }
  0x83   :  { %v291_v63 = vpop.eup %290  ;;  %v126_v0 = vmul.f32 %v289_v60, %v91_v51  ;;  %292 = vrsqrt.f32 %v392_v57  ;;  %vm132_vm5 = vweird.f32 %v289_v60  ;;  %vm153_vm7 = vmor %vm151_vm2, %vm152_vm3  ;;  %vm161_vm11 = vweird.f32 %v392_v57 }
  0x84   :  { %v147_v1 = vmul.f32 %v287_v56, %v146_v61  ;;  %v106_v2 = vmul.f32 %v291_v63, %v89_v53  ;;  %294 = vrsqrt.f32 %v394_v58  ;;  %vm112_vm6 = vweird.f32 %v291_v63  ;;  %vm133_vm9 = vmor %vm131_vm4, %vm132_vm5 }
  0x85   :  { %v127_v3 = vmul.f32 %v289_v60, %v126_v0  ;;  %296 = vrsqrt.f32 %v396_v62  ;;  %vm113_vm10 = vmor %vm111_vm8, %vm112_vm6  ;;  %vm141_vm13 = vweird.f32 %v394_v58  ;;  %vm121_vm2 = vweird.f32 %v396_v62 }
  0x86   :  { %v148_v4 = vmul.f32 0.5, %v147_v1  ;;  %v107_v5 = vmul.f32 %v291_v63, %v106_v2 }
  0x87   :  { %v128_v6 = vmul.f32 0.5, %v127_v3 }
  0x88   :  { %v149_v7 = vsub.f32 1.5, %v148_v4  ;;  %v108_v8 = vmul.f32 0.5, %v107_v5  ;;  %v67_v9 = vpop.xlane.xlu2 %66  ;;  %v64_v10 = vpop.xlane.xlu1 %63 }
  0x89   :  { %v401_v11 = vpop.eup %292  ;;  %v129_v12 = vsub.f32 1.5, %v128_v6  ;;  %v403_v13 = vmax.f32 %v67_v9, 1e-24  ;;  %v61_v14 = vpop.xlane.xlu0 %60  ;;  %v409_v19 = vmax.f32 %v64_v10, 1e-24 }
  0x8a   :  { %v405_v15 = vpop.eup %294  ;;  %v150_v16 = vmul.f32 %v287_v56, %v149_v7  ;;  %v109_v17 = vsub.f32 1.5, %v108_v8  ;;  %v156_v18 = vmul.f32 %v401_v11, %v392_v57  ;;  %v436_v33 = vmax.f32 %v61_v14, 1e-24 }
  0x8b   :  { %v297_v20 = vpop.eup %296  ;;  %v130_v21 = vmul.f32 %v289_v60, %v129_v12  ;;  %v136_v22 = vmul.f32 %v405_v15, %v394_v58  ;;  %298 = vrsqrt.f32 %v403_v13  ;;  %vm162_vm12 = vweird.f32 %v401_v11 }
  0x8c   :  { %v154_v23 = vsel %vm153_vm7, %v287_v56, %v150_v16  ;;  %v110_v24 = vmul.f32 %v291_v63, %v109_v17  ;;  %v157_v25 = vmul.f32 %v401_v11, %v156_v18  ;;  %v116_v26 = vmul.f32 %v297_v20, %v396_v62  ;;  %vm163_vm0 = vmor %vm161_vm11, %vm162_vm12 }
  0x8d   :  { %270 = vst.msk [vmem:[%s553_s1 + $0x20] sm:$0xff] %vm265_vm1, %v154_v23  ;;  %v134_v27 = vsel %vm133_vm9, %v289_v60, %v130_v21  ;;  %v137_v28 = vmul.f32 %v405_v15, %v136_v22  ;;  %300 = vrsqrt.f32 %v409_v19  ;;  %vm142_vm14 = vweird.f32 %v405_v15 }
  0x8e   :  { %268 = vst.msk [vmem:[%s553_s1 + $0x10] sm:$0xff] %vm265_vm1, %v134_v27  ;;  %v114_v29 = vsel %vm113_vm10, %v291_v63, %v110_v24  ;;  %v158_v30 = vmul.f32 0.5, %v157_v25  ;;  %v117_v31 = vmul.f32 %v297_v20, %v116_v26  ;;  %302 = vrsqrt.f32 %v436_v33  ;;  %vm143_vm3 = vmor %vm141_vm13, %vm142_vm14 }
  0x8f   :  { %266 = vst.msk [vmem:[%s553_s1] sm:$0xff] %vm265_vm1, %v114_v29  ;;  %v138_v32 = vmul.f32 0.5, %v137_v28  ;;  %vm122_vm15 = vweird.f32 %v297_v20  ;;  %vm191_vm5 = vweird.f32 %v403_v13  ;;  %vm181_vm8 = vweird.f32 %v409_v19 }
  0x90   :  { %v159_v34 = vsub.f32 1.5, %v158_v30  ;;  %v118_v35 = vmul.f32 0.5, %v117_v31  ;;  %v76_v36 = vpop.xlane.xlu2 %75  ;;  %v73_v37 = vpop.xlane.xlu1 %72  ;;  %vm123_vm4 = vmor %vm121_vm2, %vm122_vm15  ;;  %vm171_vm10 = vweird.f32 %v436_v33 }
  0x91   :  { %v299_v38 = vpop.eup %298  ;;  %v139_v39 = vsub.f32 1.5, %v138_v32  ;;  %v442_v40 = vmax.f32 %v76_v36, 1e-24  ;;  %v70_v41 = vpop.xlane.xlu0 %69  ;;  %v453_v46 = vmax.f32 %v73_v37, 1e-24 }
  0x92   :  { %v160_v42 = vmul.f32 %v401_v11, %v159_v34  ;;  %v119_v43 = vsub.f32 1.5, %v118_v35  ;;  %v186_v44 = vmul.f32 %v299_v38, %v403_v13  ;;  %v460_v51 = vmax.f32 %v70_v41, 1e-24 }
  0x93   :  { %v140_v45 = vmul.f32 %v405_v15, %v139_v39  ;;  %304 = vrsqrt.f32 %v442_v40  ;;  %v301_v47 = vpop.eup %300  ;;  %vm192_vm6 = vweird.f32 %v299_v38  ;;  %vm221_vm13 = vweird.f32 %v442_v40 }
  0x94   :  { %v164_v48 = vsel %vm163_vm0, %v401_v11, %v160_v42  ;;  %v120_v49 = vmul.f32 %v297_v20, %v119_v43  ;;  %v187_v50 = vmul.f32 %v299_v38, %v186_v44  ;;  %v176_v53 = vmul.f32 %v301_v47, %v409_v19  ;;  %v303_v56 = vpop.eup %302  ;;  %vm193_vm7 = vmor %vm191_vm5, %vm192_vm6 }
  0x95   :  { %271 = vst.msk [vmem:[%s553_s1 + $0x28] sm:$0xff] %vm265_vm1, %v164_v48  ;;  %v144_v52 = vsel %vm143_vm3, %v405_v15, %v140_v45  ;;  %306 = vrsqrt.f32 %v453_v46  ;;  %v166_v59 = vmul.f32 %v303_v56, %v436_v33  ;;  %vm182_vm9 = vweird.f32 %v301_v47 }
  0x96   :  { %269 = vst.msk [vmem:[%s553_s1 + $0x18] sm:$0xff] %vm265_vm1, %v144_v52  ;;  %v124_v54 = vsel %vm123_vm4, %v297_v20, %v120_v49  ;;  %v188_v55 = vmul.f32 0.5, %v187_v50  ;;  %308 = vrsqrt.f32 %v460_v51  ;;  %v177_v57 = vmul.f32 %v301_v47, %v176_v53  ;;  %vm183_vm12 = vmor %vm181_vm8, %vm182_vm9 }
  0x97   :  { %267 = vst.msk [vmem:[%s553_s1 + $0x8] sm:$0xff] %vm265_vm1, %v124_v54  ;;  %v167_v3 = vmul.f32 %v303_v56, %v166_v59  ;;  %vm172_vm11 = vweird.f32 %v303_v56  ;;  %vm211_vm0 = vweird.f32 %v453_v46  ;;  %vm201_vm6 = vweird.f32 %v460_v51 }
  0x98   :  { %v189_v58 = vsub.f32 1.5, %v188_v55  ;;  %v85_v60 = vpop.xlane.xlu2 %84  ;;  %v82_v61 = vpop.xlane.xlu1 %81  ;;  %v178_v63 = vmul.f32 0.5, %v177_v57  ;;  %vm173_vm15 = vmor %vm171_vm10, %vm172_vm11 }
  0x99   :  { %v305_v62 = vpop.eup %304  ;;  %v481_v0 = vmax.f32 %v85_v60, 1e-24  ;;  %v79_v1 = vpop.xlane.xlu0 %78  ;;  %v484_v5 = vmax.f32 %v82_v61, 1e-24  ;;  %v168_v10 = vmul.f32 0.5, %v167_v3 }
  0x9a   :  { %v190_v2 = vmul.f32 %v299_v38, %v189_v58  ;;  %v216_v4 = vmul.f32 %v305_v62, %v442_v40  ;;  %v179_v7 = vsub.f32 1.5, %v178_v63  ;;  %v497_v20 = vmax.f32 %v79_v1, 1e-24 }
  0x9b   :  { %v307_v6 = vpop.eup %306  ;;  %310 = vrsqrt.f32 %v481_v0  ;;  %v169_v15 = vsub.f32 1.5, %v168_v10  ;;  %vm222_vm14 = vweird.f32 %v305_v62  ;;  %vm251_vm8 = vweird.f32 %v481_v0 }
  0x9c   :  { %v309_v8 = vpop.eup %308  ;;  %v194_v9 = vsel %vm193_vm7, %v299_v38, %v190_v2  ;;  %v217_v11 = vmul.f32 %v305_v62, %v216_v4  ;;  %v206_v12 = vmul.f32 %v307_v6, %v453_v46  ;;  %v180_v13 = vmul.f32 %v301_v47, %v179_v7  ;;  %vm223_vm3 = vmor %vm221_vm13, %vm222_vm14 }
  0x9d   :  { %274 = vst.msk [vmem:[%s553_s1 + $0x40] sm:$0xff] %vm265_vm1, %v194_v9  ;;  %v196_v14 = vmul.f32 %v309_v8, %v460_v51  ;;  %312 = vrsqrt.f32 %v484_v5  ;;  %v170_v21 = vmul.f32 %v303_v56, %v169_v15  ;;  %vm212_vm2 = vweird.f32 %v307_v6 }
  0x9e   :  { %v218_v16 = vmul.f32 0.5, %v217_v11  ;;  %v207_v17 = vmul.f32 %v307_v6, %v206_v12  ;;  %v184_v18 = vsel %vm183_vm12, %v301_v47, %v180_v13  ;;  %314 = vrsqrt.f32 %v497_v20  ;;  %vm213_vm5 = vmor %vm211_vm0, %vm212_vm2 }
  0x9f   :  { %v197_v19 = vmul.f32 %v309_v8, %v196_v14  ;;  %273 = vst.msk [vmem:[%s553_s1 + $0x38] sm:$0xff] %vm265_vm1, %v184_v18  ;;  %v174_v27 = vsel %vm173_vm15, %v303_v56, %v170_v21  ;;  %vm202_vm4 = vweird.f32 %v309_v8  ;;  %vm241_vm11 = vweird.f32 %v484_v5 }
  0xa0   :  { %v219_v22 = vsub.f32 1.5, %v218_v16  ;;  %v208_v23 = vmul.f32 0.5, %v207_v17  ;;  %272 = vst.msk [vmem:[%s553_s1 + $0x30] sm:$0xff] %vm265_vm1, %v174_v27  ;;  %vm203_vm7 = vmor %vm201_vm6, %vm202_vm4  ;;  %vm231_vm15 = vweird.f32 %v497_v20 }
  0xa1   :  { %v311_v24 = vpop.eup %310  ;;  %v198_v25 = vmul.f32 0.5, %v197_v19  ;;  %v88_v26 = vpop.xlane.xlu0 %87 }
  0xa2   :  { %v220_v28 = vmul.f32 %v305_v62, %v219_v22  ;;  %v209_v29 = vsub.f32 1.5, %v208_v23  ;;  %v246_v30 = vmul.f32 %v311_v24, %v481_v0  ;;  %v104_v32 = vmax.f32 %v88_v26, 1e-24 }
  0xa3   :  { %v199_v31 = vsub.f32 1.5, %v198_v25  ;;  %v313_v33 = vpop.eup %312  ;;  %vm252_vm9 = vweird.f32 %v311_v24 }
  0xa4   :  { %v224_v34 = vsel %vm223_vm3, %v305_v62, %v220_v28  ;;  %v210_v35 = vmul.f32 %v307_v6, %v209_v29  ;;  %v247_v36 = vmul.f32 %v311_v24, %v246_v30  ;;  %v236_v38 = vmul.f32 %v313_v33, %v484_v5  ;;  %v315_v41 = vpop.eup %314  ;;  %vm253_vm10 = vmor %vm251_vm8, %vm252_vm9 }
  0xa5   :  { %277 = vst.msk [vmem:[%s553_s1 + $0x58] sm:$0xff] %vm265_vm1, %v224_v34  ;;  %v200_v37 = vmul.f32 %v309_v8, %v199_v31  ;;  %316 = vrsqrt.f32 %v104_v32  ;;  %v226_v45 = vmul.f32 %v315_v41, %v497_v20  ;;  %vm242_vm12 = vweird.f32 %v313_v33 }
  0xa6   :  { %v214_v39 = vsel %vm213_vm5, %v307_v6, %v210_v35  ;;  %v248_v40 = vmul.f32 0.5, %v247_v36  ;;  %v237_v43 = vmul.f32 %v313_v33, %v236_v38  ;;  %vm243_vm13 = vmor %vm241_vm11, %vm242_vm12  ;;  %vm232_vm14 = vweird.f32 %v315_v41 }
  0xa7   :  { %276 = vst.msk [vmem:[%s553_s1 + $0x50] sm:$0xff] %vm265_vm1, %v214_v39  ;;  %v204_v42 = vsel %vm203_vm7, %v309_v8, %v200_v37  ;;  %v227_v48 = vmul.f32 %v315_v41, %v226_v45  ;;  %vm233_vm0 = vmor %vm231_vm15, %vm232_vm14  ;;  %vm261_vm3 = vweird.f32 %v104_v32 }
  0xa8   :  { %275 = vst.msk [vmem:[%s553_s1 + $0x48] sm:$0xff] %vm265_vm1, %v204_v42  ;;  %v249_v44 = vsub.f32 1.5, %v248_v40  ;;  %v238_v46 = vmul.f32 0.5, %v237_v43 }
  0xa9   :  { %v228_v52 = vmul.f32 0.5, %v227_v48 }
  0xaa   :  { %v250_v47 = vmul.f32 %v311_v24, %v249_v44  ;;  %v239_v50 = vsub.f32 1.5, %v238_v46 }
  0xab   :  { %v317_v49 = vpop.eup %316  ;;  %v229_v55 = vsub.f32 1.5, %v228_v52 }
  0xac   :  { %v254_v51 = vsel %vm253_vm10, %v311_v24, %v250_v47  ;;  %v256_v53 = vmul.f32 %v317_v49, %v104_v32  ;;  %v240_v54 = vmul.f32 %v313_v33, %v239_v50  ;;  %vm262_vm2 = vweird.f32 %v317_v49 }
  0xad   :  { %280 = vst.msk [vmem:[%s553_s1 + $0x70] sm:$0xff] %vm265_vm1, %v254_v51  ;;  %v230_v58 = vmul.f32 %v315_v41, %v229_v55  ;;  %vm263_vm4 = vmor %vm261_vm3, %vm262_vm2 }
  0xae   :  { %v257_v56 = vmul.f32 %v317_v49, %v256_v53  ;;  %v244_v57 = vsel %vm243_vm13, %v313_v33, %v240_v54 }
  0xaf   :  { %279 = vst.msk [vmem:[%s553_s1 + $0x68] sm:$0xff] %vm265_vm1, %v244_v57  ;;  %v234_v60 = vsel %vm233_vm0, %v315_v41, %v230_v58 }
  0xb0   :  { %v258_v59 = vmul.f32 0.5, %v257_v56  ;;  %278 = vst.msk [vmem:[%s553_s1 + $0x60] sm:$0xff] %vm265_vm1, %v234_v60 }
  0xb2   :  { %v259_v61 = vsub.f32 1.5, %v258_v59 }
  0xb4   :  { %v260_v62 = vmul.f32 %v317_v49, %v259_v61 }
  0xb6   :  { %v264_v63 = vsel %vm263_vm4, %v317_v49, %v260_v62 }
  0xb7   :  { %281 = vst.msk [vmem:[%s553_s1 + $0x78] sm:$0xff] %vm265_vm1, %v264_v63 }

</bundles_post_ra>
